<compile_context>
chip_gen: v7x
topology: tpu7x:2x2x1
jax: 0.10.0
libtpu: 0.0.40
codegen_flags: <defaults>
</compile_context>

<pallas_src>
import functools

import numpy as np
import jax
import jax.numpy as jnp
from jax import lax
from jax.experimental import pallas as pl
from jax.experimental.pallas import tpu as pltpu


LANE = 128      # TPU lane width: feature dims padded to this
SUBLANE = 8     # sublane width: node count padded to this


def _round_up(v, m):
    return (v + m - 1) // m * m


# ---------------------------------------------------------------------------
# Pallas kernel: node_transform + one direction of topological message passing.
# Grid axis 0 = direction (0: forward DAG, 1: reversed DAG); per-direction
# weights / adjacency / level-ids are selected by the BlockSpec index_maps.
# The running embedding lives in the fori_loop carry (vregs); out_ref is
# written once at the end.
# ---------------------------------------------------------------------------
def giph_kernel(n_levels,
                x_ref, w1_ref, b1_ref, w2_ref, b2_ref,
                wp_ref, bp_ref, wu_ref, bu_ref,
                a_ref, lev_ref,
                out_ref):
    f32, bf16 = jnp.float32, jnp.bfloat16

    # --- node_transform: Linear -> ReLU -> Linear (bf16 inputs, f32 accum) ---
    h = jnp.maximum(
        jnp.dot(x_ref[...], w1_ref[...], preferred_element_type=f32)
        + b1_ref[...], 0.0)
    y0 = jnp.dot(h.astype(bf16), w2_ref[...],
                 preferred_element_type=f32) + b2_ref[...]

    a = a_ref[...]        # (N, N)  bf16  mean-normalized adjacency (this dir)
    wp = wp_ref[...]      # (D, D)  bf16  pre_layer weight (this direction)
    bp = bp_ref[...]      # (1, D)  f32
    wu = wu_ref[...]      # (D, D)  bf16  update_layer weight (this direction)
    bu = bu_ref[...]      # (1, D)  f32
    lev = lev_ref[...]    # (N, 1)  i32   topological level id (-1 for padding)

    def level_body(lvl, y):
        # relu(pre_layer(y))          -- K=128 matmul
        msg = jnp.maximum(
            jnp.dot(y.astype(bf16), wp, preferred_element_type=f32) + bp, 0.0)
        # mean over predecessors      -- dense adjacency matmul
        agg = jnp.dot(a, msg.astype(bf16), preferred_element_type=f32)
        # relu(update_layer(agg))     -- K=128 matmul
        upd = jnp.maximum(
            jnp.dot(agg.astype(bf16), wu, preferred_element_type=f32) + bu, 0.0)
        # only nodes of this topological level receive the residual update
        m = (lev == lvl).astype(f32)          # (N, 1), broadcast over lanes
        return y + m * upd

    unroll = True if n_levels <= 17 else 4
    y = lax.fori_loop(1, n_levels, level_body, y0, unroll=unroll)

    out_ref[...] = y.astype(out_ref.dtype)


# ---------------------------------------------------------------------------
# Wrapper: pad to MXU-friendly shapes, stack per-direction operands along a
# leading "direction" axis, and launch a grid=(2,) direction-parallel call.
# ---------------------------------------------------------------------------
def _block_vmem_bytes(shape, dtype):
    itemsize = jnp.dtype(dtype).itemsize
    dims = [int(s) for s in shape if s is not None]
    if not dims:
        return itemsize
    dims[-1] = _round_up(dims[-1], LANE)
    if len(dims) >= 2:
        packing = max(1, 4 // itemsize)
        dims[-2] = _round_up(dims[-2], SUBLANE * packing)
    return int(np.prod(dims)) * itemsize


def giph_forward(x, params, af, ab, levf, levb, n_levels):
    n, node_dim = x.shape
    d = params["w2"].shape[1]

    n_pad = _round_up(max(n, SUBLANE), SUBLANE)
    f_pad = _round_up(node_dim, LANE)
    d_pad = _round_up(d, LANE)

    f32, bf16, i32 = jnp.float32, jnp.bfloat16, jnp.int32

    def pad2(a_, r, c, dtype):
        out = jnp.zeros((r, c), dtype)
        return out.at[:a_.shape[0], :a_.shape[1]].set(a_.astype(dtype))

    def pad_lev(lev):
        out = jnp.full((n_pad, 1), -1, i32)      # padded rows never match
        return out.at[:n, :].set(lev.astype(i32))

    # shared node_transform operands
    x_p = pad2(x, n_pad, f_pad, bf16)
    w1 = pad2(params["w1"], f_pad, f_pad, bf16)
    b1 = pad2(params["b1"], 1, f_pad, f32)
    w2 = pad2(params["w2"], f_pad, d_pad, bf16)
    b2 = pad2(params["b2"], 1, d_pad, f32)

    # per-direction operands, stacked along a leading dir axis
    wp = jnp.stack([pad2(params["wpf"], d_pad, d_pad, bf16),
                    pad2(params["wpb"], d_pad, d_pad, bf16)])
    bp = jnp.stack([pad2(params["bpf"], 1, d_pad, f32),
                    pad2(params["bpb"], 1, d_pad, f32)])
    wu = jnp.stack([pad2(params["wuf"], d_pad, d_pad, bf16),
                    pad2(params["wub"], d_pad, d_pad, bf16)])
    bu = jnp.stack([pad2(params["buf"], 1, d_pad, f32),
                    pad2(params["bub"], 1, d_pad, f32)])
    a = jnp.stack([pad2(af, n_pad, n_pad, bf16),
                   pad2(ab, n_pad, n_pad, bf16)])
    lev = jnp.stack([pad_lev(levf), pad_lev(levb)])      # (2, n_pad, 1) i32

    kernel = functools.partial(giph_kernel, n_levels)

    in_specs = [
        pl.BlockSpec((n_pad, f_pad), lambda dd: (0, 0)),            # x
        pl.BlockSpec((f_pad, f_pad), lambda dd: (0, 0)),            # w1
        pl.BlockSpec((1, f_pad),     lambda dd: (0, 0)),            # b1
        pl.BlockSpec((f_pad, d_pad), lambda dd: (0, 0)),            # w2
        pl.BlockSpec((1, d_pad),     lambda dd: (0, 0)),            # b2
        pl.BlockSpec((None, d_pad, d_pad), lambda dd: (dd, 0, 0)),  # wp
        pl.BlockSpec((None, 1, d_pad),     lambda dd: (dd, 0, 0)),  # bp
        pl.BlockSpec((None, d_pad, d_pad), lambda dd: (dd, 0, 0)),  # wu
        pl.BlockSpec((None, 1, d_pad),     lambda dd: (dd, 0, 0)),  # bu
        pl.BlockSpec((None, n_pad, n_pad), lambda dd: (dd, 0, 0)),  # adjacency
        pl.BlockSpec((None, n_pad, 1),     lambda dd: (dd, 0, 0)),  # level ids
    ]
    # each direction writes its own lane-dense 128-column output block
    out_spec = pl.BlockSpec((n_pad, d_pad), lambda dd: (0, dd))

    # VMEM budget derived from the padded per-grid-step block shapes
    # (x2 for double buffering), clamped to generation-safe bounds.
    blocks = [((n_pad, f_pad), bf16), ((f_pad, f_pad), bf16), ((1, f_pad), f32),
              ((f_pad, d_pad), bf16), ((1, d_pad), f32),
              ((d_pad, d_pad), bf16), ((1, d_pad), f32),
              ((d_pad, d_pad), bf16), ((1, d_pad), f32),
              ((n_pad, n_pad), bf16), ((n_pad, 1), i32),
              ((n_pad, d_pad), bf16)]
    needed = 2 * sum(_block_vmem_bytes(s, dt) for s, dt in blocks)
    vmem_limit = int(min(max(needed + (4 << 20), 16 << 20), 96 << 20))

    out_pad = pl.pallas_call(
        kernel,
        out_shape=jax.ShapeDtypeStruct((n_pad, 2 * d_pad), jnp.bfloat16),
        grid=(2,),
        in_specs=in_specs,
        out_specs=out_spec,
        compiler_params=pltpu.CompilerParams(
            dimension_semantics=("parallel",),
            vmem_limit_bytes=vmem_limit),
    )(x_p, w1, b1, w2, b2, wp, bp, wu, bu, a, lev)

    # padded bf16 output -> module's (N, out_dim) f32 layout (wrapper-side)
    return jnp.concatenate(
        [out_pad[:n, :d].astype(jnp.float32),
         out_pad[:n, d_pad:d_pad + d].astype(jnp.float32)], axis=1)


# ---------------------------------------------------------------------------
# Pure-JAX reference (module semantics, same bf16 rounding on dot inputs).
# ---------------------------------------------------------------------------
def giph_reference(x, params, af, ab, levf, levb, n_levels):
    f32, bf16 = jnp.float32, jnp.bfloat16

    def lin(a_, w, b):
        return jnp.dot(a_.astype(bf16), w.astype(bf16),
                       preferred_element_type=f32) + b.astype(f32)

    h = jnp.maximum(lin(x, params["w1"], params["b1"]), 0.0)
    y0 = lin(h, params["w2"], params["b2"])

    def prop(y, a, wp, bp, wu, bu, lev):
        a_bf = a.astype(bf16)
        for lvl in range(1, n_levels):
            msg = jnp.maximum(lin(y, wp, bp), 0.0)
            agg = jnp.dot(a_bf, msg.astype(bf16), preferred_element_type=f32)
            upd = jnp.maximum(lin(agg, wu, bu), 0.0)
            m = (lev == lvl).astype(f32)
            y = y + m * upd
        return y

    hf = prop(y0, af, params["wpf"], params["bpf"],
              params["wuf"], params["buf"], levf)
    hb = prop(y0, ab, params["wpb"], params["bpb"],
              params["wub"], params["bub"], levb)
    return jnp.concatenate([hf, hb], axis=1)


# ---------------------------------------------------------------------------
# Graph / parameter construction (static, deterministic).
# ---------------------------------------------------------------------------
def build_direction(edges, n):
    """Mean-normalized adjacency + per-node topological level id."""
    indeg = np.zeros(n, dtype=np.float32)
    adj = np.zeros((n, n), dtype=np.float32)
    succ = [[] for _ in range(n)]
    for u, v in edges:
        adj[v, u] = 1.0
        indeg[v] += 1.0
        succ[u].append(v)
    adj_norm = adj / np.maximum(indeg, 1.0)[:, None]

    rem = indeg.copy()
    frontier = [v for v in range(n) if rem[v] == 0]
    level_ids = np.zeros((n, 1), dtype=np.int32)
    lvl = 0
    while frontier:
        for v in frontier:
            level_ids[v, 0] = lvl
        nxt = []
        for u in frontier:
            for v in succ[u]:
                rem[v] -= 1.0
                if rem[v] == 0.0:
                    nxt.append(v)
        frontier = nxt
        lvl += 1
    return jnp.asarray(adj_norm), jnp.asarray(level_ids), lvl


def init_params(key, node_dim, out_dim):
    d = out_dim // 2

    def linear(k, fan_in, fan_out):
        kw, kb = jax.random.split(k)
        bound = 1.0 / float(fan_in) ** 0.5
        w = jax.random.uniform(kw, (fan_in, fan_out), jnp.float32, -bound, bound)
        b = jax.random.uniform(kb, (1, fan_out), jnp.float32, -bound, bound)
        return w, b

    ks = jax.random.split(key, 6)
    w1, b1 = linear(ks[0], node_dim, node_dim)   # node_transform hidden
    w2, b2 = linear(ks[1], node_dim, d)          # node_transform output
    wpf, bpf = linear(ks[2], d, d)               # fmp.pre_layer
    wuf, buf = linear(ks[3], d, d)               # fmp.update_layer
    wpb, bpb = linear(ks[4], d, d)               # bmp.pre_layer
    wub, bub = linear(ks[5], d, d)               # bmp.update_layer
    return dict(w1=w1, b1=b1, w2=w2, b2=b2,
                wpf=wpf, bpf=bpf, wuf=wuf, buf=buf,
                wpb=wpb, bpb=bpb, wub=wub, bub=bub)


if __name__ == "__main__":
    N = 8            # nodes in the DAG
    NODE_DIM = 16
    OUT_DIM = 32     # per-direction embedding dim d = 16

    # small static DAG
    edges = [(0, 2), (1, 2), (2, 3), (2, 4), (3, 5), (4, 5), (5, 6), (5, 7)]
    edges_rev = [(v, u) for (u, v) in edges]

    af, levf, nlf = build_direction(edges, N)        # forward propagation
    ab, levb, nlb = build_direction(edges_rev, N)    # reversed propagation
    # A DAG and its reverse have the same number of topological levels.
    assert nlf == nlb
    n_levels = nlf

    key = jax.random.PRNGKey(0)
    kx, kp = jax.random.split(key)
    x = jax.random.normal(kx, (N, NODE_DIM), dtype=jnp.float32)
    params = init_params(kp, NODE_DIM, OUT_DIM)

    out = giph_forward(x, params, af, ab, levf, levb, n_levels)
    out = jax.block_until_ready(out)

    ref = giph_reference(x, params, af, ab, levf, levb, n_levels)
    assert out.shape == (N, OUT_DIM)
    # kernel output is bf16 (f32 accumulation inside); allow bf16 rounding.
    assert jnp.allclose(out, ref, atol=2e-2, rtol=2e-2), "mismatch vs reference"

    print("KERNEL_OK")
</pallas_src>

<mosaic_0001>
module attributes {stable_mosaic.version = 11 : i64} {
  func.func @giph_kernel(%arg0: i32, %arg1: memref<8x128xbf16, #tpu.memory_space<vmem>>, %arg2: memref<128x128xbf16, #tpu.memory_space<vmem>>, %arg3: memref<1x128xf32, #tpu.memory_space<vmem>>, %arg4: memref<128x128xbf16, #tpu.memory_space<vmem>>, %arg5: memref<1x128xf32, #tpu.memory_space<vmem>>, %arg6: memref<1x128x128xbf16, #tpu.memory_space<vmem>>, %arg7: memref<1x1x128xf32, #tpu.memory_space<vmem>>, %arg8: memref<1x128x128xbf16, #tpu.memory_space<vmem>>, %arg9: memref<1x1x128xf32, #tpu.memory_space<vmem>>, %arg10: memref<1x8x8xbf16, #tpu.memory_space<vmem>>, %arg11: memref<1x8x1xi32, #tpu.memory_space<vmem>>, %arg12: memref<8x128xbf16, #tpu.memory_space<vmem>>) attributes {dimension_semantics = [#tpu.dimension_semantics<parallel>], iteration_bounds = array<i64: 2>, scalar_prefetch = 0 : i64, scratch_operands = 0 : i64, tpu.core_type = #tpu.core_type<tc>, window_params = [{pipeline_mode = #tpu.pipeline_mode<synchronous>, transform_indices = @transform_0, window_bounds = array<i64: 8, 128>}, {pipeline_mode = #tpu.pipeline_mode<synchronous>, transform_indices = @transform_1, window_bounds = array<i64: 128, 128>}, {pipeline_mode = #tpu.pipeline_mode<synchronous>, transform_indices = @transform_2, window_bounds = array<i64: 1, 128>}, {pipeline_mode = #tpu.pipeline_mode<synchronous>, transform_indices = @transform_3, window_bounds = array<i64: 128, 128>}, {pipeline_mode = #tpu.pipeline_mode<synchronous>, transform_indices = @transform_4, window_bounds = array<i64: 1, 128>}, {transform_indices = @transform_5, window_bounds = array<i64: 1, 128, 128>}, {transform_indices = @transform_6, window_bounds = array<i64: 1, 1, 128>}, {transform_indices = @transform_7, window_bounds = array<i64: 1, 128, 128>}, {transform_indices = @transform_8, window_bounds = array<i64: 1, 1, 128>}, {transform_indices = @transform_9, window_bounds = array<i64: 1, 8, 8>}, {transform_indices = @transform_10, window_bounds = array<i64: 1, 8, 1>}, {transform_indices = @transform_11, window_bounds = array<i64: 8, 128>}]} {
    %c0 = arith.constant 0 : index
    %c0_0 = arith.constant 0 : index
    %0 = vector.load %arg1[%c0, %c0_0] : memref<8x128xbf16, #tpu.memory_space<vmem>>, vector<8x128xbf16>
    %c0_1 = arith.constant 0 : index
    %c0_2 = arith.constant 0 : index
    %1 = vector.load %arg2[%c0_1, %c0_2] : memref<128x128xbf16, #tpu.memory_space<vmem>>, vector<128x128xbf16>
    %cst = arith.constant dense<0.000000e+00> : vector<8x128xf32>
    %2 = tpu.matmul %0, %1, %cst {dimension_numbers = #tpu.dot_dimension_numbers<[1], [0], [0], [1], [0, 0, 1, 1], [], []>} : vector<8x128xbf16>, vector<128x128xbf16>, vector<8x128xf32> -> vector<8x128xf32>
    %c0_3 = arith.constant 0 : index
    %c0_4 = arith.constant 0 : index
    %3 = vector.load %arg3[%c0_3, %c0_4] : memref<1x128xf32, #tpu.memory_space<vmem>>, vector<1x128xf32>
    %4 = vector.broadcast %3 : vector<1x128xf32> to vector<8x128xf32>
    %5 = arith.addf %2, %4 : vector<8x128xf32>
    %cst_5 = arith.constant 0.000000e+00 : f32
    %6 = vector.broadcast %cst_5 : f32 to vector<8x128xf32>
    %7 = arith.maximumf %5, %6 : vector<8x128xf32>
    %8 = arith.truncf %7 : vector<8x128xf32> to vector<8x128xbf16>
    %c0_6 = arith.constant 0 : index
    %c0_7 = arith.constant 0 : index
    %9 = vector.load %arg4[%c0_6, %c0_7] : memref<128x128xbf16, #tpu.memory_space<vmem>>, vector<128x128xbf16>
    %cst_8 = arith.constant dense<0.000000e+00> : vector<8x128xf32>
    %10 = tpu.matmul %8, %9, %cst_8 {dimension_numbers = #tpu.dot_dimension_numbers<[1], [0], [0], [1], [0, 0, 1, 1], [], []>} : vector<8x128xbf16>, vector<128x128xbf16>, vector<8x128xf32> -> vector<8x128xf32>
    %c0_9 = arith.constant 0 : index
    %c0_10 = arith.constant 0 : index
    %11 = vector.load %arg5[%c0_9, %c0_10] : memref<1x128xf32, #tpu.memory_space<vmem>>, vector<1x128xf32>
    %12 = vector.broadcast %11 : vector<1x128xf32> to vector<8x128xf32>
    %13 = arith.addf %10, %12 : vector<8x128xf32>
    %c0_11 = arith.constant 0 : index
    %c0_12 = arith.constant 0 : index
    %c0_13 = arith.constant 0 : index
    %14 = vector.load %arg10[%c0_11, %c0_12, %c0_13] : memref<1x8x8xbf16, #tpu.memory_space<vmem>>, vector<1x8x8xbf16>
    %15 = vector.shape_cast %14 : vector<1x8x8xbf16> to vector<8x8xbf16>
    %c0_14 = arith.constant 0 : index
    %c0_15 = arith.constant 0 : index
    %c0_16 = arith.constant 0 : index
    %16 = vector.load %arg6[%c0_14, %c0_15, %c0_16] : memref<1x128x128xbf16, #tpu.memory_space<vmem>>, vector<1x128x128xbf16>
    %17 = vector.shape_cast %16 : vector<1x128x128xbf16> to vector<128x128xbf16>
    %c0_17 = arith.constant 0 : index
    %c0_18 = arith.constant 0 : index
    %c0_19 = arith.constant 0 : index
    %18 = vector.load %arg7[%c0_17, %c0_18, %c0_19] : memref<1x1x128xf32, #tpu.memory_space<vmem>>, vector<1x1x128xf32>
    %19 = vector.shape_cast %18 : vector<1x1x128xf32> to vector<1x128xf32>
    %c0_20 = arith.constant 0 : index
    %c0_21 = arith.constant 0 : index
    %c0_22 = arith.constant 0 : index
    %20 = vector.load %arg8[%c0_20, %c0_21, %c0_22] : memref<1x128x128xbf16, #tpu.memory_space<vmem>>, vector<1x128x128xbf16>
    %21 = vector.shape_cast %20 : vector<1x128x128xbf16> to vector<128x128xbf16>
    %c0_23 = arith.constant 0 : index
    %c0_24 = arith.constant 0 : index
    %c0_25 = arith.constant 0 : index
    %22 = vector.load %arg9[%c0_23, %c0_24, %c0_25] : memref<1x1x128xf32, #tpu.memory_space<vmem>>, vector<1x1x128xf32>
    %23 = vector.shape_cast %22 : vector<1x1x128xf32> to vector<1x128xf32>
    %c0_26 = arith.constant 0 : index
    %c0_27 = arith.constant 0 : index
    %c0_28 = arith.constant 0 : index
    %24 = vector.load %arg11[%c0_26, %c0_27, %c0_28] : memref<1x8x1xi32, #tpu.memory_space<vmem>>, vector<1x8x1xi32>
    %25 = vector.shape_cast %24 : vector<1x8x1xi32> to vector<8x1xi32>
    %c1_i32 = arith.constant 1 : i32
    %26 = arith.truncf %13 : vector<8x128xf32> to vector<8x128xbf16>
    %cst_29 = arith.constant dense<0.000000e+00> : vector<8x128xf32>
    %27 = tpu.matmul %26, %17, %cst_29 {dimension_numbers = #tpu.dot_dimension_numbers<[1], [0], [0], [1], [0, 0, 1, 1], [], []>} : vector<8x128xbf16>, vector<128x128xbf16>, vector<8x128xf32> -> vector<8x128xf32>
    %28 = vector.broadcast %19 : vector<1x128xf32> to vector<8x128xf32>
    %29 = arith.addf %27, %28 : vector<8x128xf32>
    %cst_30 = arith.constant 0.000000e+00 : f32
    %30 = vector.broadcast %cst_30 : f32 to vector<8x128xf32>
    %31 = arith.maximumf %29, %30 : vector<8x128xf32>
    %32 = arith.truncf %31 : vector<8x128xf32> to vector<8x128xbf16>
    %cst_31 = arith.constant dense<0.000000e+00> : vector<8x128xf32>
    %33 = tpu.matmul %15, %32, %cst_31 {dimension_numbers = #tpu.dot_dimension_numbers<[1], [0], [0], [1], [0, 0, 1, 1], [], []>} : vector<8x8xbf16>, vector<8x128xbf16>, vector<8x128xf32> -> vector<8x128xf32>
    %34 = arith.truncf %33 : vector<8x128xf32> to vector<8x128xbf16>
    %cst_32 = arith.constant dense<0.000000e+00> : vector<8x128xf32>
    %35 = tpu.matmul %34, %21, %cst_32 {dimension_numbers = #tpu.dot_dimension_numbers<[1], [0], [0], [1], [0, 0, 1, 1], [], []>} : vector<8x128xbf16>, vector<128x128xbf16>, vector<8x128xf32> -> vector<8x128xf32>
    %36 = vector.broadcast %23 : vector<1x128xf32> to vector<8x128xf32>
    %37 = arith.addf %35, %36 : vector<8x128xf32>
    %cst_33 = arith.constant 0.000000e+00 : f32
    %38 = vector.broadcast %cst_33 : f32 to vector<8x128xf32>
    %39 = arith.maximumf %37, %38 : vector<8x128xf32>
    %40 = vector.broadcast %c1_i32 : i32 to vector<8x1xi32>
    %41 = arith.cmpi eq, %25, %40 : vector<8x1xi32>
    %42 = arith.extui %41 : vector<8x1xi1> to vector<8x1xi32>
    %43 = arith.sitofp %42 : vector<8x1xi32> to vector<8x1xf32>
    %44 = vector.broadcast %43 : vector<8x1xf32> to vector<8x128xf32>
    %45 = arith.mulf %44, %39 : vector<8x128xf32>
    %46 = arith.addf %13, %45 : vector<8x128xf32>
    %c2_i32 = arith.constant 2 : i32
    %47 = arith.truncf %46 : vector<8x128xf32> to vector<8x128xbf16>
    %cst_34 = arith.constant dense<0.000000e+00> : vector<8x128xf32>
    %48 = tpu.matmul %47, %17, %cst_34 {dimension_numbers = #tpu.dot_dimension_numbers<[1], [0], [0], [1], [0, 0, 1, 1], [], []>} : vector<8x128xbf16>, vector<128x128xbf16>, vector<8x128xf32> -> vector<8x128xf32>
    %49 = vector.broadcast %19 : vector<1x128xf32> to vector<8x128xf32>
    %50 = arith.addf %48, %49 : vector<8x128xf32>
    %cst_35 = arith.constant 0.000000e+00 : f32
    %51 = vector.broadcast %cst_35 : f32 to vector<8x128xf32>
    %52 = arith.maximumf %50, %51 : vector<8x128xf32>
    %53 = arith.truncf %52 : vector<8x128xf32> to vector<8x128xbf16>
    %cst_36 = arith.constant dense<0.000000e+00> : vector<8x128xf32>
    %54 = tpu.matmul %15, %53, %cst_36 {dimension_numbers = #tpu.dot_dimension_numbers<[1], [0], [0], [1], [0, 0, 1, 1], [], []>} : vector<8x8xbf16>, vector<8x128xbf16>, vector<8x128xf32> -> vector<8x128xf32>
    %55 = arith.truncf %54 : vector<8x128xf32> to vector<8x128xbf16>
    %cst_37 = arith.constant dense<0.000000e+00> : vector<8x128xf32>
    %56 = tpu.matmul %55, %21, %cst_37 {dimension_numbers = #tpu.dot_dimension_numbers<[1], [0], [0], [1], [0, 0, 1, 1], [], []>} : vector<8x128xbf16>, vector<128x128xbf16>, vector<8x128xf32> -> vector<8x128xf32>
    %57 = vector.broadcast %23 : vector<1x128xf32> to vector<8x128xf32>
    %58 = arith.addf %56, %57 : vector<8x128xf32>
    %cst_38 = arith.constant 0.000000e+00 : f32
    %59 = vector.broadcast %cst_38 : f32 to vector<8x128xf32>
    %60 = arith.maximumf %58, %59 : vector<8x128xf32>
    %61 = vector.broadcast %c2_i32 : i32 to vector<8x1xi32>
    %62 = arith.cmpi eq, %25, %61 : vector<8x1xi32>
    %63 = arith.extui %62 : vector<8x1xi1> to vector<8x1xi32>
    %64 = arith.sitofp %63 : vector<8x1xi32> to vector<8x1xf32>
    %65 = vector.broadcast %64 : vector<8x1xf32> to vector<8x128xf32>
    %66 = arith.mulf %65, %60 : vector<8x128xf32>
    %67 = arith.addf %46, %66 : vector<8x128xf32>
    %c3_i32 = arith.constant 3 : i32
    %68 = arith.truncf %67 : vector<8x128xf32> to vector<8x128xbf16>
    %cst_39 = arith.constant dense<0.000000e+00> : vector<8x128xf32>
    %69 = tpu.matmul %68, %17, %cst_39 {dimension_numbers = #tpu.dot_dimension_numbers<[1], [0], [0], [1], [0, 0, 1, 1], [], []>} : vector<8x128xbf16>, vector<128x128xbf16>, vector<8x128xf32> -> vector<8x128xf32>
    %70 = vector.broadcast %19 : vector<1x128xf32> to vector<8x128xf32>
    %71 = arith.addf %69, %70 : vector<8x128xf32>
    %cst_40 = arith.constant 0.000000e+00 : f32
    %72 = vector.broadcast %cst_40 : f32 to vector<8x128xf32>
    %73 = arith.maximumf %71, %72 : vector<8x128xf32>
    %74 = arith.truncf %73 : vector<8x128xf32> to vector<8x128xbf16>
    %cst_41 = arith.constant dense<0.000000e+00> : vector<8x128xf32>
    %75 = tpu.matmul %15, %74, %cst_41 {dimension_numbers = #tpu.dot_dimension_numbers<[1], [0], [0], [1], [0, 0, 1, 1], [], []>} : vector<8x8xbf16>, vector<8x128xbf16>, vector<8x128xf32> -> vector<8x128xf32>
    %76 = arith.truncf %75 : vector<8x128xf32> to vector<8x128xbf16>
    %cst_42 = arith.constant dense<0.000000e+00> : vector<8x128xf32>
    %77 = tpu.matmul %76, %21, %cst_42 {dimension_numbers = #tpu.dot_dimension_numbers<[1], [0], [0], [1], [0, 0, 1, 1], [], []>} : vector<8x128xbf16>, vector<128x128xbf16>, vector<8x128xf32> -> vector<8x128xf32>
    %78 = vector.broadcast %23 : vector<1x128xf32> to vector<8x128xf32>
    %79 = arith.addf %77, %78 : vector<8x128xf32>
    %cst_43 = arith.constant 0.000000e+00 : f32
    %80 = vector.broadcast %cst_43 : f32 to vector<8x128xf32>
    %81 = arith.maximumf %79, %80 : vector<8x128xf32>
    %82 = vector.broadcast %c3_i32 : i32 to vector<8x1xi32>
    %83 = arith.cmpi eq, %25, %82 : vector<8x1xi32>
    %84 = arith.extui %83 : vector<8x1xi1> to vector<8x1xi32>
    %85 = arith.sitofp %84 : vector<8x1xi32> to vector<8x1xf32>
    %86 = vector.broadcast %85 : vector<8x1xf32> to vector<8x128xf32>
    %87 = arith.mulf %86, %81 : vector<8x128xf32>
    %88 = arith.addf %67, %87 : vector<8x128xf32>
    %c4_i32 = arith.constant 4 : i32
    %89 = arith.truncf %88 : vector<8x128xf32> to vector<8x128xbf16>
    %cst_44 = arith.constant dense<0.000000e+00> : vector<8x128xf32>
    %90 = tpu.matmul %89, %17, %cst_44 {dimension_numbers = #tpu.dot_dimension_numbers<[1], [0], [0], [1], [0, 0, 1, 1], [], []>} : vector<8x128xbf16>, vector<128x128xbf16>, vector<8x128xf32> -> vector<8x128xf32>
    %91 = vector.broadcast %19 : vector<1x128xf32> to vector<8x128xf32>
    %92 = arith.addf %90, %91 : vector<8x128xf32>
    %cst_45 = arith.constant 0.000000e+00 : f32
    %93 = vector.broadcast %cst_45 : f32 to vector<8x128xf32>
    %94 = arith.maximumf %92, %93 : vector<8x128xf32>
    %95 = arith.truncf %94 : vector<8x128xf32> to vector<8x128xbf16>
    %cst_46 = arith.constant dense<0.000000e+00> : vector<8x128xf32>
    %96 = tpu.matmul %15, %95, %cst_46 {dimension_numbers = #tpu.dot_dimension_numbers<[1], [0], [0], [1], [0, 0, 1, 1], [], []>} : vector<8x8xbf16>, vector<8x128xbf16>, vector<8x128xf32> -> vector<8x128xf32>
    %97 = arith.truncf %96 : vector<8x128xf32> to vector<8x128xbf16>
    %cst_47 = arith.constant dense<0.000000e+00> : vector<8x128xf32>
    %98 = tpu.matmul %97, %21, %cst_47 {dimension_numbers = #tpu.dot_dimension_numbers<[1], [0], [0], [1], [0, 0, 1, 1], [], []>} : vector<8x128xbf16>, vector<128x128xbf16>, vector<8x128xf32> -> vector<8x128xf32>
    %99 = vector.broadcast %23 : vector<1x128xf32> to vector<8x128xf32>
    %100 = arith.addf %98, %99 : vector<8x128xf32>
    %cst_48 = arith.constant 0.000000e+00 : f32
    %101 = vector.broadcast %cst_48 : f32 to vector<8x128xf32>
    %102 = arith.maximumf %100, %101 : vector<8x128xf32>
    %103 = vector.broadcast %c4_i32 : i32 to vector<8x1xi32>
    %104 = arith.cmpi eq, %25, %103 : vector<8x1xi32>
    %105 = arith.extui %104 : vector<8x1xi1> to vector<8x1xi32>
    %106 = arith.sitofp %105 : vector<8x1xi32> to vector<8x1xf32>
    %107 = vector.broadcast %106 : vector<8x1xf32> to vector<8x128xf32>
    %108 = arith.mulf %107, %102 : vector<8x128xf32>
    %109 = arith.addf %88, %108 : vector<8x128xf32>
    %c4_i32_49 = arith.constant 4 : i32
    %110 = arith.truncf %109 : vector<8x128xf32> to vector<8x128xbf16>
    %c0_50 = arith.constant 0 : index
    %c0_51 = arith.constant 0 : index
    %111 = vector.load %arg12[%c0_50, %c0_51] : memref<8x128xbf16, #tpu.memory_space<vmem>>, vector<8x128xbf16>
    tpu.vector_store %arg12[%c0_50, %c0_51], %110 {strides = array<i32>} : memref<8x128xbf16, #tpu.memory_space<vmem>>, vector<8x128xbf16>,
    return
  }
  func.func @transform_0(%arg0: i32) -> (i32, i32) {
    %c0_i32 = arith.constant 0 : i32
    %c0_i32_0 = arith.constant 0 : i32
    %c0_i32_1 = arith.constant 0 : i32
    return %c0_i32, %c0_i32_0 : i32, i32
  }
  func.func @transform_1(%arg0: i32) -> (i32, i32) {
    %c0_i32 = arith.constant 0 : i32
    %c0_i32_0 = arith.constant 0 : i32
    %c0_i32_1 = arith.constant 0 : i32
    return %c0_i32, %c0_i32_0 : i32, i32
  }
  func.func @transform_2(%arg0: i32) -> (i32, i32) {
    %c0_i32 = arith.constant 0 : i32
    %c0_i32_0 = arith.constant 0 : i32
    %c0_i32_1 = arith.constant 0 : i32
    return %c0_i32, %c0_i32_0 : i32, i32
  }
  func.func @transform_3(%arg0: i32) -> (i32, i32) {
    %c0_i32 = arith.constant 0 : i32
    %c0_i32_0 = arith.constant 0 : i32
    %c0_i32_1 = arith.constant 0 : i32
    return %c0_i32, %c0_i32_0 : i32, i32
  }
  func.func @transform_4(%arg0: i32) -> (i32, i32) {
    %c0_i32 = arith.constant 0 : i32
    %c0_i32_0 = arith.constant 0 : i32
    %c0_i32_1 = arith.constant 0 : i32
    return %c0_i32, %c0_i32_0 : i32, i32
  }
  func.func @transform_5(%arg0: i32) -> (i32, i32, i32) {
    %c0_i32 = arith.constant 0 : i32
    %c0_i32_0 = arith.constant 0 : i32
    %c0_i32_1 = arith.constant 0 : i32
    return %arg0, %c0_i32, %c0_i32_0 : i32, i32, i32
  }
  func.func @transform_6(%arg0: i32) -> (i32, i32, i32) {
    %c0_i32 = arith.constant 0 : i32
    %c0_i32_0 = arith.constant 0 : i32
    %c0_i32_1 = arith.constant 0 : i32
    return %arg0, %c0_i32, %c0_i32_0 : i32, i32, i32
  }
  func.func @transform_7(%arg0: i32) -> (i32, i32, i32) {
    %c0_i32 = arith.constant 0 : i32
    %c0_i32_0 = arith.constant 0 : i32
    %c0_i32_1 = arith.constant 0 : i32
    return %arg0, %c0_i32, %c0_i32_0 : i32, i32, i32
  }
  func.func @transform_8(%arg0: i32) -> (i32, i32, i32) {
    %c0_i32 = arith.constant 0 : i32
    %c0_i32_0 = arith.constant 0 : i32
    %c0_i32_1 = arith.constant 0 : i32
    return %arg0, %c0_i32, %c0_i32_0 : i32, i32, i32
  }
  func.func @transform_9(%arg0: i32) -> (i32, i32, i32) {
    %c0_i32 = arith.constant 0 : i32
    %c0_i32_0 = arith.constant 0 : i32
    %c0_i32_1 = arith.constant 0 : i32
    return %arg0, %c0_i32, %c0_i32_0 : i32, i32, i32
  }
  func.func @transform_10(%arg0: i32) -> (i32, i32, i32) {
    %c0_i32 = arith.constant 0 : i32
    %c0_i32_0 = arith.constant 0 : i32
    %c0_i32_1 = arith.constant 0 : i32
    return %arg0, %c0_i32, %c0_i32_0 : i32, i32, i32
  }
  func.func @transform_11(%arg0: i32) -> (i32, i32) {
    %c0_i32 = arith.constant 0 : i32
    %c0_i32_0 = arith.constant 0 : i32
    return %c0_i32, %arg0 : i32, i32
  }
}

</mosaic_0001>

<bundles_post_ra>
// kernel: tpu_custom_call.1
= control target key start
LH: loop header
LB: loop body
LE: loop exit
PB: predicated region body
PF: predicated region fallthrough
CT: control target
= control target key end

     0   :  { %s2982_s0 = inlined_call_operand.vmem [shape: bf16[8,128], index: 0, kind: input, shape index: {}]   ;;  %s2983_s1 = inlined_call_operand.hbm [shape: bf16[128,128], index: 1, kind: input, shape index: {}]   ;;  %s2984_s2 = inlined_call_operand.vmem [shape: f32[1,128], index: 2, kind: input, shape index: {}]   ;;  %s2985_s3 = inlined_call_operand.hbm [shape: bf16[128,128], index: 3, kind: input, shape index: {}]   ;;  %s2986_s4 = inlined_call_operand.vmem [shape: f32[1,128], index: 4, kind: input, shape index: {}]   ;;  %s2987_s5 = inlined_call_operand.hbm [shape: bf16[2,128,128], index: 5, kind: input, shape index: {}]   ;;  %s2988_s6 = inlined_call_operand.vmem [shape: f32[2,1,128], index: 6, kind: input, shape index: {}]   ;;  %s2989_s7 = inlined_call_operand.hbm [shape: bf16[2,128,128], index: 7, kind: input, shape index: {}]   ;;  %s2990_s8 = inlined_call_operand.vmem [shape: f32[2,1,128], index: 8, kind: input, shape index: {}]   ;;  %s2991_s9 = inlined_call_operand.vmem [shape: bf16[2,8,8], index: 9, kind: input, shape index: {}]   ;;  %s2992_s10 = inlined_call_operand.vmem [shape: s32[2,8,1], index: 10, kind: input, shape index: {}]   ;;  %s2993_s11 = inlined_call_operand.hbm [shape: bf16[8,256], index: 11, kind: output, shape index: {}]  }
   0x1   :  { %3013 = sst [smem:[#allocation20_spill]] %s2983_s1 }
   0x2   :  { %3014 = sst [smem:[#allocation21_spill]] %s2987_s5 }
   0x3   :  { %3015 = sst [smem:[#allocation22_spill]] %s2990_s8 }
   0x4   :  { %3016 = sst [smem:[#allocation23_spill]] %s2992_s10 }
   0x5   :  { %3017 = sst [smem:[#allocation24_spill]] %s2993_s11 }
   0x6   :  { %16 = vsyncpa [#allocation3], 0 }
   0x7   :  { %17 = vsyncpa [#allocation6], 0 }
   0x8   :  { %18 = vsyncpa [#allocation4], 0 }
   0x9   :  { %20 = vsyncpa [#allocation4 + $0x1], 0  ;;  %s2389_s17 = smov 0   ;;  %s2391_s18 = smov 0  }
   0xa   :  { %s2393_s19 = smov 0   ;;  %s2395_s20 = smov 0  }
   0xb LB: > { %3018 = sst [smem:[#allocation14_spill]] %s2305_s17  ;;  %s2410_s21 = sadd.s32 4294967295, %s2317_s20   ;;  %s2317_s20 = sphi %s2395_s20, %s3057_s20   ;;  %s2313_s19 = sphi %s2393_s19, %s3059_s19   ;;  %s2309_s18 = sphi %s2391_s18, %s3061_s18   ;;  %s2305_s17 = sphi %s2389_s17, %s3060_s17  }
   0xc   : > { %3019 = sst [smem:[#allocation15_spill]] %s2313_s19  ;;  %s1625_s22 = sadd.s32 4294967294, %s2317_s20  }
   0xd   : > { %s2414_s23 = sadd.s32 1, %s2317_s20   ;;  %s138_s24 = sadd.s32 1, %s2313_s19 }
   0xe   : > { %3020 = sst [smem:[#allocation16_spill]] %s2414_s23  ;;  %s135_s25 = ssub.s32 %s2317_s20, %s2414_s23 }
   0xf   : > { %p145_p0 = scmp.ne.s32.totalorder %s2313_s19, %s2309_s18  ;;  %p136_p1 = scmp.eq.s32.totalorder %s135_s25, 0 }
  0x10   : > { %p146_p2 = scmp.eq.s32.totalorder %s2317_s20, 0  ;;  %p151_p3 = scmp.ne.s32.totalorder %s2309_s18, %s2305_s17 }
  0x11   : > { %p2998_p4 = scmp.eq.s32.totalorder %s2410_s21, 0  ;;  %p305_p7 = scmp.eq.s32.totalorder %s2410_s21, 1 }
  0x12   : > { %s2426_s26 = scalar_select %p136_p1, %s2313_s19, %s138_s24  }
  0x13   : > { %p2428_p5 = por %p146_p2, %p145_p0  ;;  %p2434_p6 = por %p2998_p4, %p151_p3 }
  0x14   : > { %3021 = sst [smem:[#allocation17_spill]] %s2426_s26  ;;  %p311_p8 = scmp.eq.s32.totalorder %s1625_s22, 1 }
  0x15   : > { %s3022_s27 = scalar_select %p2428_p5, 1, 0 }
  0x16   : > { %s3023_s28 = scalar_select %p2434_p6, 1, 0 }
  0x17   : > { %p1626_p9 = scmp.ge.s32.totalorder %s2317_s20, 1  ;;  %p318_p10 = scmp.lt.s32.totalorder %s2317_s20, 3 }
  0x18   : > { %p2441_p11 = por %p305_p7, %p145_p0  ;;  %p2445_p12 = por %p311_p8, %p151_p3 }
  0x19   : > { %p2449_p13 = pnand %p1626_p9, %p318_p10  ;;  %s2319_s13 = smov [#allocation2]  }
  0x1a   : > { %s3024_s29 = scalar_select %p2441_p11, 1, 0 }
  0x1b   : > { %s3026_s30 = scalar_select %p2445_p12, 1, 0 }
  0x1c   : > { %3025 = sst [smem:[#allocation18_spill]] %s3024_s29  ;;  %p2030_p1 = pneg %p2449_p13 }
  0x1d   : > { %3027 = sst [smem:[#allocation19_spill]] %s3026_s30  ;;  %s333_s14 = sshll.u32 %s2319_s13, 4  ;;  %s334_s14 = int_to_ptr.vmem [resolvable:$true] %s333_s14 }
  0x1e   : > { %s3028_s12 = scalar_select %p2449_p13, 1, 0 }
  0x1f   : > { %p2457_p2 = pnand %p2030_p1, %p2998_p4  ;;  %s366_s16 = sand.u32 1, %s2317_s20  }
  0x20   : > { %s3030_s1 = sld [smem:[#allocation20_spill]] }
  0x21   : > { %p3008_p8 = pneg %p2457_p2 }
  0x26   : > { %s2127_s25 = scalar_lea.hbm %s3030_s1, 1024 }
  0x27   : > { %p2128_p7 = scmp.ne.s32.totalorder %s3030_s1, %s2127_s25  ;;  %p2134_p1 = scmp.lt.u32.totalorder %s2127_s25, %s3030_s1 }
  0x29   : > { %p2130_p9 = pnand %p3008_p8, %p2128_p7 }
  0x2b   : > { %p2131_p10 = pneg %p2130_p9 }
  0x2d   : > { %p2136_p0 = pnand %p2134_p1, %p2131_p10 }
  0x2f   : > { %2139 = shalt.err (!%p2136_p0)
}
  0x30   : > { %s2140_s17 = scalar_lea.vmem %s334_s14, 1024  ;;  %p2148_p11 = scmp.lt.s32.totalorder %s334_s14, %s334_s14 }
  0x31   : > { %p2141_p4 = scmp.ne.s32.totalorder %s334_s14, %s2140_s17  ;;  %p2149_p6 = scmp.lt.s32.totalorder %s2140_s17, %s2140_s17 }
  0x33   : > { %p2143_p3 = pnand %p2141_p4, %p3008_p8  ;;  %p2150_p13 = por %p2149_p6, %p2148_p11 }
  0x35   : > { %p2144_p12 = pneg %p2143_p3 }
  0x37   : > { %p2151_p5 = pnand %p2150_p13, %p2144_p12 }
  0x39   : > { %2154 = shalt.err (!%p2151_p5)
}
  0x3a   : > { %s3006_s23 = smov 64   ;;  %s2321_s26 = smov 4  }
  0x3b   : > { %2033 = dma.hbm_to_vmem [thread:$0]  (!%p2457_p2), %s3030_s1, 1024, %s334_s14, [#allocation3], %s3006_s23, %s3006_s23, %s2321_s26  }
  0x3c   : > { %p3031_p4 = scmp.ne.s32.totalorder %s3022_s27, 0  ;;  %p3032_p6 = scmp.lt.s32.totalorder %s2317_s20, 2 }
  0x3d   : > { %s368_s24 = sand.u32 1, %s2313_s19   ;;  %s3005_s13 = sshll.u32 %s2317_s20, 10 }
  0x3e   : > { %p2493_p11 = pnand %p3032_p6, %p3031_p4  ;;  %s2498_s25 = sshll.u32 %s368_s24, 6 }
  0x3f   : > { %s3034_s5 = sld [smem:[#allocation21_spill]]  ;;  %s370_s27 = scalar_lea.vmem [#allocation7], %s2498_s25 }
  0x40   : > { %s3033_s17 = scalar_select %p2493_p11, 1, 0 }
  0x41   : > { %s377_s14 = sshll.u32 %s370_s27, 4  ;;  %s2511_s30 = scalar_lea.sflag [#allocation3], %s366_s16  ;;  %s2509_s14 = int_to_ptr.vmem [resolvable:$true] %s377_s14 }
  0x42   : > { %p3010_p12 = pneg %p2493_p11 }
  0x45   : > { %s2506_s8 = scalar_lea.hbm %s3034_s5, %s3005_s13  ;;  %s2160_s24 = scalar_lea.hbm %s3034_s5, 2048 }
  0x46   : > { %s2155_s22 = scalar_lea.hbm %s2506_s8, 1024  ;;  %p2161_p3 = scmp.lt.u32.totalorder %s2506_s8, %s3034_s5 }
  0x47   : > { %p2156_p5 = scmp.ne.s32.totalorder %s2506_s8, %s2155_s22  ;;  %p2162_p7 = scmp.lt.u32.totalorder %s2160_s24, %s2155_s22 }
  0x48   : > { %p2164_p10 = scmp.lt.u32.totalorder %s2155_s22, %s2506_s8 }
  0x49   : > { %p2158_p13 = pnand %p3010_p12, %p2156_p5  ;;  %p2163_p9 = por %p2162_p7, %p2161_p3 }
  0x4b   : > { %p2159_p0 = pneg %p2158_p13  ;;  %p2165_p1 = por %p2164_p10, %p2163_p9 }
  0x4d   : > { %p2166_p4 = pnand %p2165_p1, %p2159_p0 }
  0x4f   : > { %2169 = shalt.err (!%p2166_p4)
}
  0x50   : > { %s2170_s16 = scalar_lea.vmem %s2509_s14, 1024  ;;  %s2322_s27 = smov [#allocation7]  }
  0x51   : > { %p2171_p6 = scmp.ne.s32.totalorder %s2509_s14, %s2170_s16  ;;  %s2175_s11 = sshll.u32 %s2322_s27, 4  ;;  %s2176_s11 = int_to_ptr.vmem [resolvable:$false] %s2175_s11 }
  0x52   : > { %s2177_s23 = scalar_lea.vmem %s2176_s11, 2048  ;;  %p2178_p8 = scmp.lt.s32.totalorder %s2509_s14, %s2176_s11 }
  0x53   : > { %p2173_p5 = pnand %p2171_p6, %p3010_p12  ;;  %p2179_p3 = scmp.lt.s32.totalorder %s2177_s23, %s2170_s16 }
  0x55   : > { %p2174_p13 = pneg %p2173_p5  ;;  %p2180_p7 = por %p2179_p3, %p2178_p8 }
  0x57   : > { %p2181_p9 = pnand %p2180_p7, %p2174_p13 }
  0x59   : > { %2184 = shalt.err (!%p2181_p9)
}
  0x5a   : > { %s3035_s13 = smov 64   ;;  %s2323_s22 = smov [#allocation5]  }
  0x5b   : > { %2040 = dma.hbm_to_vmem [thread:$0]  (!%p2493_p11), %s2506_s8, 1024, %s2509_s14, %s2511_s30, %s3035_s13, %s3035_s13, %s2321_s26  }
  0x5c   : > { %s349_s29 = sshll.u32 %s2323_s22, 4  ;;  %s3036_s24 = sshll.u32 %s2317_s20, 10  ;;  %s350_s29 = int_to_ptr.vmem [resolvable:$true] %s349_s29 }
  0x5d   : > { %s2547_s11 = scalar_lea.hbm %s2989_s7, %s3036_s24  ;;  %s2185_s5 = scalar_lea.hbm %s2985_s3, 1024 }
  0x5e   : > { %p2186_p8 = scmp.ne.s32.totalorder %s2985_s3, %s2185_s5  ;;  %p3037_p0 = pneg %p2457_p2 }
  0x5f   : > { %p2192_p4 = scmp.lt.u32.totalorder %s2185_s5, %s2985_s3 }
  0x60   : > { %p2188_p10 = pnand %p2186_p8, %p3037_p0 }
  0x62   : > { %p2189_p1 = pneg %p2188_p10 }
  0x64   : > { %p2194_p6 = pnand %p2192_p4, %p2189_p1 }
  0x66   : > { %2197 = shalt.err (!%p2194_p6)
}
  0x67   : > { %s2198_s22 = scalar_lea.vmem %s350_s29, 1024  ;;  %p3038_p13 = pmov %p3037_p0 }
  0x68   : > { %p2199_p5 = scmp.ne.s32.totalorder %s350_s29, %s2198_s22  ;;  %p2206_p9 = scmp.lt.s32.totalorder %s350_s29, %s350_s29 }
  0x69   : > { %p2207_p12 = scmp.lt.s32.totalorder %s2198_s22, %s2198_s22 }
  0x6a   : > { %p2201_p3 = pnand %p2199_p5, %p3038_p13 }
  0x6b   : > { %p2208_p11 = por %p2207_p12, %p2206_p9 }
  0x6c   : > { %p2202_p7 = pneg %p2201_p3 }
  0x6e   : > { %p2209_p0 = pnand %p2208_p11, %p2202_p7 }
  0x70   : > { %2212 = shalt.err (!%p2209_p0)
}
  0x71   : > { %2036 = dma.hbm_to_vmem [thread:$0]  (!%p2457_p2), %s2985_s3, 1024, %s350_s29, [#allocation6], %s3035_s13, %s3035_s13, %s2321_s26  }
  0x72   : > { %s397_s10 = scalar_lea.vmem [#allocation8], %s2498_s25  ;;  %s2213_s24 = scalar_lea.hbm %s2547_s11, 1024 }
  0x73   : > { %s404_s19 = sshll.u32 %s397_s10, 4  ;;  %p2214_p11 = scmp.ne.s32.totalorder %s2547_s11, %s2213_s24  ;;  %s2573_s19 = int_to_ptr.vmem [resolvable:$true] %s404_s19 }
  0x74   : > { %p3039_p12 = scmp.ne.s32.totalorder %s3033_s17, 0  ;;  %s2218_s16 = scalar_lea.hbm %s2989_s7, 2048 }
  0x75   : > { %p2219_p4 = scmp.lt.u32.totalorder %s2547_s11, %s2989_s7  ;;  %p2220_p6 = scmp.lt.u32.totalorder %s2218_s16, %s2213_s24 }
  0x76   : > { %p3040_p8 = pneg %p3039_p12  ;;  %p2222_p5 = scmp.lt.u32.totalorder %s2213_s24, %s2547_s11 }
  0x77   : > { %p2221_p2 = por %p2220_p6, %p2219_p4 }
  0x78   : > { %p2216_p10 = pnand %p2214_p11, %p3040_p8 }
  0x79   : > { %p2223_p13 = por %p2222_p5, %p2221_p2 }
  0x7a   : > { %p2217_p1 = pneg %p2216_p10 }
  0x7c   : > { %p2224_p3 = pnand %p2223_p13, %p2217_p1 }
  0x7e   : > { %2227 = shalt.err (!%p2224_p3)
}
  0x7f   : > { %s2228_s25 = scalar_lea.vmem %s2573_s19, 1024  ;;  %p3041_p9 = pmov %p3040_p8 }
  0x80   : > { %p2229_p7 = scmp.ne.s32.totalorder %s2573_s19, %s2228_s25  ;;  %s2324_s29 = smov [#allocation8]  }
  0x81   : > { %s2233_s14 = sshll.u32 %s2324_s29, 4  ;;  %s2234_s14 = int_to_ptr.vmem [resolvable:$false] %s2233_s14 }
  0x82   : > { %p2231_p0 = pnand %p2229_p7, %p3041_p9  ;;  %s2235_s22 = scalar_lea.vmem %s2234_s14, 2048 }
  0x83   : > { %p2236_p8 = scmp.lt.s32.totalorder %s2573_s19, %s2234_s14  ;;  %p2237_p10 = scmp.lt.s32.totalorder %s2235_s22, %s2228_s25 }
  0x84   : > { %p2232_p11 = pneg %p2231_p0 }
  0x85   : > { %p2238_p4 = por %p2237_p10, %p2236_p8 }
  0x87   : > { %p2239_p6 = pnand %p2238_p4, %p2232_p11 }
  0x89   : > { %2242 = shalt.err (!%p2239_p6)
}
  0x8a   : > { %2043 = dma.hbm_to_vmem [thread:$0]  (!%p3039_p12), %s2547_s11, 1024, %s2573_s19, %s2511_s30, %s3035_s13, %s3035_s13, %s2321_s26  }
  0x8b   : > { %p3042_p1 = scmp.ne.s32.totalorder %s3028_s12, 0 }
  0x8c   : > { %p3043_p2 = scmp.eq.s32.totalorder (!%p3042_p1), %s2410_s21, 0 }
  0x8d   : > { %436 = sbr.rel (%p3042_p1) target bundleno = 3271 (0xcc7), region = 64 }
  0x94   : > { %2288 = dma.done.wait (%p3043_p2), [#allocation3], 1024   ;;  %p3044_p5 = pmov %p3043_p2 }
  0x95   : > { %p3045_p13 = pmov %p3043_p2 }
  0x96   : > { %2290 = vsyncadd (%p3044_p5), [#allocation3], 4294966272 }
  0x97   : > { %2292 = dma.done.wait (%p3045_p13), [#allocation6], 1024   ;;  %p3046_p3 = pmov %p3043_p2 }
  0x98   : > { %s446_s17 = sand.u32 1, %s2410_s21   ;;  %s2614_s26 = sand.u32 1, %s2309_s18  }
  0x99   : > { %2294 = vsyncadd (%p3046_p3), [#allocation6], 4294966272  ;;  %s1639_s12 = sshll.u32 %s2614_s26, 6  ;;  %s447_s30 = scalar_lea.sflag [#allocation3], %s446_s17 }
  0x9a   : > { %s2619_s13 = scalar_lea.vmem [#allocation7], %s1639_s12  ;;  %p3047_p12 = scmp.ne.s32.totalorder %s3023_s28, 0 }
  0x9c   : > { %2296 = dma.done.wait (%p3047_p12), %s447_s30, 2048  }
  0x9d   : > { %2298 = vsyncadd (%p3047_p12), %s447_s30, 4294965248  ;;  %v2325_v0 = vmov 0.0   ;;  %vm2326_vm0 = vmmov 0   ;;  %v2095_v1 = vld [vmem:[#allocation2] sm:$0xff]   ;;  %v2096_v2 = vld [vmem:[#allocation2 + $0x8] sm:$0xff]   ;;  %s2724_s24 = scalar_lea.vmem [#allocation8], %s1639_s12 }
  0x9e   : > { %1792 = vmatprep.subr.bf16.mxu0 %v2325_v0  ;;  %1808 = vmatprep.mubr.msk.bf16.mxu0 %vm2326_vm0, %v2325_v0  ;;  %v2097_v3 = vld [vmem:[#allocation2 + $0x10] sm:$0xff]   ;;  %v2103_v4 = vld [vmem:[#allocation5] sm:$0xff]   ;;  %v2098_v5 = vld [vmem:[#allocation2 + $0x18] sm:$0xff]   ;;  %p517_p7 = scmp.lt.s32.totalorder %s2410_s21, 1  ;;  %vm894_vm1 = vcmask 1043456   ;;  %vm890_vm2 = vcmask 64512  }
  0x9f   : > { %1812 = vmatprep.subr.bf16.mxu1 %v2325_v0  ;;  %1828 = vmatprep.mubr.msk.bf16.mxu1 %vm2326_vm0, %v2325_v0  ;;  %v2104_v6 = vld [vmem:[#allocation5 + $0x8] sm:$0xff]   ;;  %v2099_v7 = vld [vmem:[#allocation2 + $0x20] sm:$0xff]   ;;  %v2105_v8 = vld [vmem:[#allocation5 + $0x10] sm:$0xff]   ;;  %v2327_v59 = vmov 0   ;;  %s3048_s30 = sld [smem:[#allocation23_spill]]  ;;  %s3049_s1 = sld [smem:[#allocation22_spill]] }
  0xa0   : > { %1793 = vmatpush3.bf16.msra.mxu0 %v2095_v1  ;;  %1813 = vmatpush3.bf16.msra.mxu1 %v2103_v4  ;;  %v2100_v9 = vld [vmem:[#allocation2 + $0x28] sm:$0xff]   ;;  %v2106_v10 = vld [vmem:[#allocation5 + $0x18] sm:$0xff]   ;;  %v2101_v11 = vld [vmem:[#allocation2 + $0x30] sm:$0xff]   ;;  %s2728_s15 = scalar_select %p517_p7, %s2410_s21, 1 }
  0xa1   : > { %1794 = vmatprep.subr.bf16.mxu0 %v2325_v0  ;;  %1814 = vmatprep.subr.bf16.mxu1 %v2325_v0  ;;  %v2107_v12 = vld [vmem:[#allocation5 + $0x20] sm:$0xff]   ;;  %v2102_v13 = vld [vmem:[#allocation2 + $0x38] sm:$0xff]   ;;  %v2108_v14 = vld [vmem:[#allocation5 + $0x28] sm:$0xff]   ;;  %s1641_s10 = sshll.u32 %s2614_s26, 2  ;;  %s3050_s19 = sld [smem:[#allocation18_spill]] }
  0xa2   : > { %v532_v15 = vld [vmem:[%s2982_s0] sm:$0xf]  ;;  %v2109_v16 = vld [vmem:[#allocation5 + $0x30] sm:$0xff]   ;;  %v2110_v17 = vld [vmem:[#allocation5 + $0x38] sm:$0xff]   ;;  %s519_s23 = scalar_lea.vmem %s2988_s6, %s2728_s15  ;;  %s1642_s8 = sshll.u32 %s2728_s15, 2  ;;  %2093 = vset.pattern.permute.xlu0 %v2327_v59  ;;  %2094 = vset.pattern.permute.xlu1 %v2327_v59 }
  0xa3   : > { %v2653_v18 = vld [vmem:[%s2619_s13] sm:$0xff]   ;;  %v2657_v19 = vld [vmem:[%s2619_s13 + $0x8] sm:$0xff]   ;;  %v2662_v20 = vld [vmem:[%s2619_s13 + $0x10] sm:$0xff]   ;;  %s526_s14 = scalar_lea.vmem %s2991_s9, %s1642_s8  ;;  %s1643_s22 = sshll.u32 %s2728_s15, 3 }
  0xa4   : > { %1795 = vmatpush3.bf16.msra.mxu0 %v2096_v2  ;;  %1815 = vmatpush3.bf16.msra.mxu1 %v2104_v6  ;;  %v2667_v21 = vld [vmem:[%s2619_s13 + $0x18] sm:$0xff]   ;;  %v2672_v22 = vld [vmem:[%s2619_s13 + $0x20] sm:$0xff]   ;;  %v2677_v23 = vld [vmem:[%s2619_s13 + $0x28] sm:$0xff]   ;;  %s3051_s8 = sld [smem:[#allocation24_spill]]  ;;  %s1461_s29 = scalar_lea.sflag [#allocation4], %s2614_s26 }
  0xa5   : > { %1796 = vmatprep.subr.bf16.mxu0 %v2325_v0  ;;  %1816 = vmatprep.subr.bf16.mxu1 %v2325_v0  ;;  %v2682_v24 = vld [vmem:[%s2619_s13 + $0x30] sm:$0xff]   ;;  %v1644_v25 = vld [vmem:[%s2984_s2] ss:$0 sm:$0xff]  ;;  %v2693_v33 = vld [vmem:[%s2619_s13 + $0x38] sm:$0xff]   ;;  %s530_s13 = scalar_lea.vmem %s3048_s30, %s1643_s22  ;;  %s522_s5 = scalar_lea.vmem %s3049_s1, %s2728_s15 }
  0xa6   : > { %v1653_v34 = vld [vmem:[%s2986_s4] ss:$0 sm:$0xff]  ;;  %v2752_v52 = vld [vmem:[%s2724_s24 + $0x8] sm:$0xff]   ;;  %v2759_v53 = vld [vmem:[%s2724_s24 + $0x10] sm:$0xff]   ;;  %s516_s15 = scalar_lea.vmem [#allocation9], %s1641_s10 }
  0xa7   : > { %v2734_v41 = vld [vmem:[%s519_s23] ss:$0 sm:$0xff]  ;;  %v2764_v54 = vld [vmem:[%s2724_s24 + $0x18] sm:$0xff]   ;;  %v2774_v56 = vld [vmem:[%s2724_s24 + $0x28] sm:$0xff]   ;;  %s1474_s27 = sshll.u32 %s516_s15, 4  ;;  %p3052_p0 = scmp.ne.s32.totalorder %s3050_s19, 0  ;;  %s2940_s27 = int_to_ptr.vmem [resolvable:$true] %s1474_s27 }
  0xa8   : > { %1797 = vmatpush3.bf16.msra.mxu0 %v2097_v3  ;;  %1817 = vmatpush3.bf16.msra.mxu1 %v2105_v8  ;;  %v2742_v50 = vld [vmem:[%s526_s14] sm:$0xf]  ;;  %v2779_v57 = vld [vmem:[%s2724_s24 + $0x30] sm:$0xff]   ;;  %v2785_v58 = vld [vmem:[%s2724_s24 + $0x38] sm:$0xff]   ;;  %s2243_s14 = scalar_lea.vmem %s2940_s27, 64 }
  0xa9   : > { %1798 = vmatprep.subr.bf16.mxu0 %v2325_v0  ;;  %1818 = vmatprep.subr.bf16.mxu1 %v2325_v0  ;;  %v2745_v51 = vld [vmem:[%s2724_s24] sm:$0xff]   ;;  %p2244_p9 = scmp.ne.s32.totalorder %s2940_s27, %s2243_s14 }
  0xaa   : > { %v2769_v55 = vld [vmem:[%s2724_s24 + $0x20] sm:$0xff]   ;;  %s1689_s24 = sshll.u32 %s2410_s21, 6  ;;  %s2328_s21 = smov [#allocation9]  }
  0xab   : > { %v2793_v60 = vld [vmem:[%s530_s13] sm:$0xff]  ;;  %s2938_s25 = scalar_lea.hbm %s3051_s8, %s1689_s24  ;;  %p2245_p11 = pnand %p2244_p9, %p3052_p0 }
  0xac   : > { %1799 = vmatpush3.bf16.msra.mxu0 %v2098_v5  ;;  %1819 = vmatpush3.bf16.msra.mxu1 %v2106_v10  ;;  %vm1034_vm3 = vcmp.eq.s32.totalorder %v2793_v60, 1  ;;  %vm1172_vm4 = vcmp.eq.s32.totalorder %v2793_v60, 2  ;;  %v2805_v5 = vld [vmem:[%s522_s5] ss:$0 sm:$0xff]  ;;  %vm1310_vm5 = vcmp.eq.s32.totalorder %v2793_v60, 3  ;;  %vm1448_vm6 = vcmp.eq.s32.totalorder %v2793_v60, 4 }
  0xad   : > { %1800 = vmatprep.subr.bf16.mxu0 %v2325_v0  ;;  %1820 = vmatprep.subr.bf16.mxu1 %v2325_v0  ;;  %v1681_v61 = vsel %vm1034_vm3, 1.0, %v2325_v0  ;;  %v1683_v62 = vsel %vm1172_vm4, 1.0, %v2325_v0  ;;  %p2246_p8 = pneg %p2245_p11  ;;  %s2247_s22 = sshll.u32 %s2328_s21, 4  ;;  %s2248_s22 = int_to_ptr.vmem [resolvable:$false] %s2247_s22 }
  0xae   : > { %1039 = vperm.xlu0 %2093, %v1681_v61   ;;  %s2249_s17 = scalar_lea.vmem %s2248_s22, 128  ;;  %p2250_p10 = scmp.lt.s32.totalorder %s2940_s27, %s2248_s22 }
  0xaf   : > { %p2251_p4 = scmp.lt.s32.totalorder %s2249_s17, %s2243_s14 }
  0xb0   : > { %1801 = vmatpush3.bf16.msra.mxu0 %v2099_v7  ;;  %1821 = vmatpush3.bf16.msra.mxu1 %v2107_v12 }
  0xb1   : > { %1802 = vmatprep.subr.bf16.mxu0 %v2325_v0  ;;  %1822 = vmatprep.subr.bf16.mxu1 %v2325_v0  ;;  %p2252_p6 = por %p2251_p4, %p2250_p10 }
  0xb2   : > { %1177 = vperm.xlu0 %2093, %v1683_v62  }
  0xb3   : > { %p2253_p1 = pnand %p2252_p6, %p2246_p8 }
  0xb4   : > { %1803 = vmatpush3.bf16.msra.mxu0 %v2100_v9  ;;  %1823 = vmatpush3.bf16.msra.mxu1 %v2108_v14 }
  0xb5   : > { %1804 = vmatprep.subr.bf16.mxu0 %v2325_v0  ;;  %1824 = vmatprep.subr.bf16.mxu1 %v2325_v0 }
  0xb8   : > { %1805 = vmatpush3.bf16.msra.mxu0 %v2101_v11  ;;  %1825 = vmatpush3.bf16.msra.mxu1 %v2109_v16 }
  0xb9   : > { %1806 = vmatprep.subr.bf16.mxu0 %v2325_v0  ;;  %1826 = vmatprep.subr.bf16.mxu1 %v2325_v0 }
  0xbc   : > { %1807 = vmatpush3.bf16.msra.mxu0 %v2102_v13  ;;  %1827 = vmatpush3.bf16.msra.mxu1 %v2110_v17 }
  0xbd   : > { %1832 = vmatprep.subr.bf16.mxu0 %v2325_v0  ;;  %1852 = vmatprep.subr.bf16.mxu1 %v2325_v0 }
  0xbf   : > { %1809 = vmatmul.mubr.bf16.vlgmr.msra.gmra.mrb[0].mxu0 %v532_v15 }
  0xc0   : > { %1848 = vmatprep.mubr.msk.bf16.mxu0 %vm2326_vm0, %v2325_v0  ;;  %1833 = vmatpush3.bf16.msra.mxu0 %v2653_v18 }
  0xc1   : > { %1834 = vmatprep.subr.bf16.mxu0 %v2325_v0 }
  0xc4   : > { %1835 = vmatpush3.bf16.msra.mxu0 %v2657_v19 }
  0xc5   : > { %1836 = vmatprep.subr.bf16.mxu0 %v2325_v0 }
  0xc8   : > { %1837 = vmatpush3.bf16.msra.mxu0 %v2662_v20 }
  0xc9   : > { %1838 = vmatprep.subr.bf16.mxu0 %v2325_v0 }
  0xcc   : > { %1839 = vmatpush3.bf16.msra.mxu0 %v2667_v21 }
  0xcd   : > { %1840 = vmatprep.subr.bf16.mxu0 %v2325_v0 }
  0xd0   : > { %1841 = vmatpush3.bf16.msra.mxu0 %v2672_v22 }
  0xd1   : > { %1842 = vmatprep.subr.bf16.mxu0 %v2325_v0 }
  0xd4   : > { %1843 = vmatpush3.bf16.msra.mxu0 %v2677_v23 }
  0xd5   : > { %1844 = vmatprep.subr.bf16.mxu0 %v2325_v0 }
  0xd8   : > { %1845 = vmatpush3.bf16.msra.mxu0 %v2682_v24 }
  0xd9   : > { %1846 = vmatprep.subr.bf16.mxu0 %v2325_v0 }
  0xdc   : > { %1847 = vmatpush3.bf16.msra.mxu0 %v2693_v33 }
  0xdd   : > { %1878 = vmatprep.subr.bf16.mxu0 %v2325_v0 }
 0x12d   : > { %v1040_v12 = vpop.permute.xlu0 %1039 }
 0x192   : > { %v638_v26 = vpop.f32.mrb[0].mxu0 }
 0x193   : > { %v639_v27 = vadd.f32 %v1644_v25, %v638_v26  ;;  %v1810_v28 = vpop.f32.mrb[1].mxu0 }
 0x194   : > { %v641_v29 = vpop.f32.mrb[2].mxu0 }
 0x195   : > { %v644_v30 = vmax.f32 %v639_v27, 0.0  ;;  %v1811_v31 = vpop.f32.mrb[3].mxu0 }
 0x197   : > { %v645_v32 = vpack.c.bf16 %v644_v30, %v644_v30 }
 0x199   : > { %1829 = vmatmul.mubr.bf16.vlgmr.msra.gmra.mrb[0].mxu1 %v645_v32 }
 0x19a   : > { %1854 = vmatprep.mubr.msk.bf16.mxu1 %vm2326_vm0, %v2325_v0 }
 0x26c   : > { %v751_v35 = vpop.f32.mrb[0].mxu1 }
 0x26d   : > { %v2700_v36 = vadd.f32 %v1653_v34, %v751_v35  ;;  %v1830_v37 = vpop.f32.mrb[1].mxu1 }
 0x26e   : > { %v754_v38 = vpop.f32.mrb[2].mxu1 }
 0x26f   : > { %v793_v39 = vpack.c.bf16 %v2700_v36, %v2700_v36  ;;  %v1831_v40 = vpop.f32.mrb[3].mxu1 }
 0x271   : > { %1849 = vmatmul.mubr.bf16.vlgmr.msra.gmra.mrb[4].mxu0 %v793_v39 }
 0x272   : > { %1879 = vmatpush3.bf16.msra.mxu0 %v2653_v18  ;;  %1894 = vmatprep.mubr.msk.bf16.mxu0 %vm2326_vm0, %v2325_v0 }
 0x273   : > { %1880 = vmatprep.subr.bf16.mxu0 %v2325_v0 }
 0x276   : > { %1881 = vmatpush3.bf16.msra.mxu0 %v2657_v19 }
 0x277   : > { %1882 = vmatprep.subr.bf16.mxu0 %v2325_v0 }
 0x27a   : > { %1883 = vmatpush3.bf16.msra.mxu0 %v2662_v20 }
 0x27b   : > { %1884 = vmatprep.subr.bf16.mxu0 %v2325_v0 }
 0x27e   : > { %1885 = vmatpush3.bf16.msra.mxu0 %v2667_v21 }
 0x27f   : > { %1886 = vmatprep.subr.bf16.mxu0 %v2325_v0 }
 0x282   : > { %1887 = vmatpush3.bf16.msra.mxu0 %v2672_v22 }
 0x283   : > { %1888 = vmatprep.subr.bf16.mxu0 %v2325_v0 }
 0x286   : > { %1889 = vmatpush3.bf16.msra.mxu0 %v2677_v23 }
 0x287   : > { %1890 = vmatprep.subr.bf16.mxu0 %v2325_v0 }
 0x28a   : > { %1891 = vmatpush3.bf16.msra.mxu0 %v2682_v24 }
 0x28b   : > { %1892 = vmatprep.subr.bf16.mxu0 %v2325_v0 }
 0x28e   : > { %1893 = vmatpush3.bf16.msra.mxu0 %v2693_v33 }
 0x28f   : > { %1924 = vmatprep.subr.bf16.mxu0 %v2325_v0 }
 0x344   : > { %v882_v42 = vpop.f32.mrb[4].mxu0 }
 0x345   : > { %v883_v43 = vadd.f32 %v2734_v41, %v882_v42  ;;  %v1850_v44 = vpop.f32.mrb[5].mxu0 }
 0x346   : > { %v885_v45 = vpop.f32.mrb[6].mxu0  ;;  %v1178_v44 = vpop.permute.xlu0 %1177 }
 0x347   : > { %v888_v46 = vmax.f32 %v883_v43, 0.0  ;;  %v1851_v47 = vpop.f32.mrb[7].mxu0 }
 0x349   : > { %v889_v48 = vpack.c.bf16 %v888_v46, %v888_v46 }
 0x34b   : > { %v896_v49 = vsel %vm894_vm1, %v889_v48, 0 }
 0x34c   : > { %1853 = vmatpush3.bf16.msra.mxu1 %v896_v49 }
 0x34d   : > { %1858 = vmatprep.subr.bf16.mxu1 %v2325_v0 }
 0x34f   : > { %1855 = vmatmul.mubr.msk.bf16.vlgmr.msra.gmra.mrb[4].mxu1 %vm890_vm2, %v2742_v50 }
 0x350   : > { %1859 = vmatpush3.bf16.msra.mxu1 %v2745_v51  ;;  %1874 = vmatprep.mubr.msk.bf16.mxu1 %vm2326_vm0, %v2325_v0 }
 0x351   : > { %1860 = vmatprep.subr.bf16.mxu1 %v2325_v0 }
 0x354   : > { %1861 = vmatpush3.bf16.msra.mxu1 %v2752_v52 }
 0x355   : > { %1862 = vmatprep.subr.bf16.mxu1 %v2325_v0 }
 0x358   : > { %1863 = vmatpush3.bf16.msra.mxu1 %v2759_v53 }
 0x359   : > { %1864 = vmatprep.subr.bf16.mxu1 %v2325_v0 }
 0x35c   : > { %1865 = vmatpush3.bf16.msra.mxu1 %v2764_v54 }
 0x35d   : > { %1866 = vmatprep.subr.bf16.mxu1 %v2325_v0 }
 0x360   : > { %1867 = vmatpush3.bf16.msra.mxu1 %v2769_v55 }
 0x361   : > { %1868 = vmatprep.subr.bf16.mxu1 %v2325_v0 }
 0x364   : > { %1869 = vmatpush3.bf16.msra.mxu1 %v2774_v56 }
 0x365   : > { %1870 = vmatprep.subr.bf16.mxu1 %v2325_v0 }
 0x368   : > { %1871 = vmatpush3.bf16.msra.mxu1 %v2779_v57 }
 0x369   : > { %1872 = vmatprep.subr.bf16.mxu1 %v2325_v0 }
 0x36c   : > { %1873 = vmatpush3.bf16.msra.mxu1 %v2785_v58 }
 0x36d   : > { %1898 = vmatprep.subr.bf16.mxu1 %v2325_v0 }
 0x422   : > { %v932_v63 = vpop.f32.mrb[4].mxu1 }
 0x423   : > { %v938_v1 = vpack.c.bf16 %v932_v63, %v932_v63  ;;  %v1856_v2 = vpop.f32.mrb[5].mxu1 }
 0x424   : > { %v935_v3 = vpop.f32.mrb[6].mxu1 }
 0x425   : > { %v1857_v4 = vpop.f32.mrb[7].mxu1  ;;  %1875 = vmatmul.mubr.bf16.vlgmr.msra.gmra.mrb[8].mxu1 %v938_v1 }
 0x426   : > { %1900 = vmatprep.mubr.msk.bf16.mxu1 %vm2326_vm0, %v2325_v0 }
 0x4f8   : > { %v1027_v6 = vpop.f32.mrb[8].mxu1 }
 0x4f9   : > { %v1028_v7 = vadd.f32 %v2805_v5, %v1027_v6  ;;  %v1876_v8 = vpop.f32.mrb[9].mxu1 }
 0x4fa   : > { %v1030_v9 = vpop.f32.mrb[10].mxu1 }
 0x4fb   : > { %v1033_v10 = vmax.f32 %v1028_v7, 0.0  ;;  %v1877_v11 = vpop.f32.mrb[11].mxu1 }
 0x4fd   : > { %v1042_v13 = vmul.f32 %v1040_v12, %v1033_v10 }
 0x4ff   : > { %v2809_v14 = vadd.f32 %v1042_v13, %v2700_v36 }
 0x501   : > { %v1044_v15 = vpack.c.bf16 %v2809_v14, %v2809_v14 }
 0x503   : > { %1895 = vmatmul.mubr.bf16.vlgmr.msra.gmra.mrb[8].mxu0 %v1044_v15 }
 0x504   : > { %1925 = vmatpush3.bf16.msra.mxu0 %v2653_v18  ;;  %1940 = vmatprep.mubr.msk.bf16.mxu0 %vm2326_vm0, %v2325_v0 }
 0x505   : > { %1926 = vmatprep.subr.bf16.mxu0 %v2325_v0 }
 0x508   : > { %1927 = vmatpush3.bf16.msra.mxu0 %v2657_v19 }
 0x509   : > { %1928 = vmatprep.subr.bf16.mxu0 %v2325_v0 }
 0x50c   : > { %1929 = vmatpush3.bf16.msra.mxu0 %v2662_v20 }
 0x50d   : > { %1930 = vmatprep.subr.bf16.mxu0 %v2325_v0 }
 0x510   : > { %1931 = vmatpush3.bf16.msra.mxu0 %v2667_v21 }
 0x511   : > { %1932 = vmatprep.subr.bf16.mxu0 %v2325_v0 }
 0x514   : > { %1933 = vmatpush3.bf16.msra.mxu0 %v2672_v22 }
 0x515   : > { %1934 = vmatprep.subr.bf16.mxu0 %v2325_v0 }
 0x518   : > { %1935 = vmatpush3.bf16.msra.mxu0 %v2677_v23 }
 0x519   : > { %1936 = vmatprep.subr.bf16.mxu0 %v2325_v0 }
 0x51c   : > { %1937 = vmatpush3.bf16.msra.mxu0 %v2682_v24 }
 0x51d   : > { %1938 = vmatprep.subr.bf16.mxu0 %v2325_v0 }
 0x520   : > { %1939 = vmatpush3.bf16.msra.mxu0 %v2693_v33 }
 0x521   : > { %1970 = vmatprep.subr.bf16.mxu0 %v2325_v0 }
 0x5d6   : > { %v1079_v16 = vpop.f32.mrb[8].mxu0 }
 0x5d7   : > { %v1080_v17 = vadd.f32 %v2734_v41, %v1079_v16  ;;  %v1896_v25 = vpop.f32.mrb[9].mxu0 }
 0x5d8   : > { %v1082_v26 = vpop.f32.mrb[10].mxu0 }
 0x5d9   : > { %v1085_v27 = vmax.f32 %v1080_v17, 0.0  ;;  %v1897_v28 = vpop.f32.mrb[11].mxu0 }
 0x5db   : > { %v1086_v29 = vpack.c.bf16 %v1085_v27, %v1085_v27 }
 0x5dd   : > { %v1088_v30 = vsel %vm894_vm1, %v1086_v29, 0 }
 0x5de   : > { %1899 = vmatpush3.bf16.msra.mxu1 %v1088_v30 }
 0x5df   : > { %1904 = vmatprep.subr.bf16.mxu1 %v2325_v0 }
 0x5e1   : > { %1901 = vmatmul.mubr.msk.bf16.vlgmr.msra.gmra.mrb[12].mxu1 %vm890_vm2, %v2742_v50 }
 0x5e2   : > { %1905 = vmatpush3.bf16.msra.mxu1 %v2745_v51  ;;  %1920 = vmatprep.mubr.msk.bf16.mxu1 %vm2326_vm0, %v2325_v0 }
 0x5e3   : > { %1906 = vmatprep.subr.bf16.mxu1 %v2325_v0 }
 0x5e6   : > { %1907 = vmatpush3.bf16.msra.mxu1 %v2752_v52 }
 0x5e7   : > { %1908 = vmatprep.subr.bf16.mxu1 %v2325_v0 }
 0x5ea   : > { %1909 = vmatpush3.bf16.msra.mxu1 %v2759_v53 }
 0x5eb   : > { %1910 = vmatprep.subr.bf16.mxu1 %v2325_v0 }
 0x5ee   : > { %1911 = vmatpush3.bf16.msra.mxu1 %v2764_v54 }
 0x5ef   : > { %1912 = vmatprep.subr.bf16.mxu1 %v2325_v0 }
 0x5f2   : > { %1913 = vmatpush3.bf16.msra.mxu1 %v2769_v55 }
 0x5f3   : > { %1914 = vmatprep.subr.bf16.mxu1 %v2325_v0 }
 0x5f6   : > { %1915 = vmatpush3.bf16.msra.mxu1 %v2774_v56 }
 0x5f7   : > { %1916 = vmatprep.subr.bf16.mxu1 %v2325_v0 }
 0x5fa   : > { %1917 = vmatpush3.bf16.msra.mxu1 %v2779_v57 }
 0x5fb   : > { %1918 = vmatprep.subr.bf16.mxu1 %v2325_v0 }
 0x5fe   : > { %1919 = vmatpush3.bf16.msra.mxu1 %v2785_v58 }
 0x5ff   : > { %1944 = vmatprep.subr.bf16.mxu1 %v2325_v0 }
 0x6b4   : > { %v1124_v31 = vpop.f32.mrb[12].mxu1 }
 0x6b5   : > { %v1130_v32 = vpack.c.bf16 %v1124_v31, %v1124_v31  ;;  %v1902_v34 = vpop.f32.mrb[13].mxu1 }
 0x6b6   : > { %v1127_v35 = vpop.f32.mrb[14].mxu1 }
 0x6b7   : > { %v1903_v36 = vpop.f32.mrb[15].mxu1  ;;  %1921 = vmatmul.mubr.bf16.vlgmr.msra.gmra.mrb[16].mxu1 %v1130_v32 }
 0x6b8   : > { %1946 = vmatprep.mubr.msk.bf16.mxu1 %vm2326_vm0, %v2325_v0 }
 0x78a   : > { %v1165_v37 = vpop.f32.mrb[16].mxu1 }
 0x78b   : > { %v1166_v38 = vadd.f32 %v2805_v5, %v1165_v37  ;;  %v1922_v39 = vpop.f32.mrb[17].mxu1 }
 0x78c   : > { %v1168_v40 = vpop.f32.mrb[18].mxu1 }
 0x78d   : > { %v1171_v42 = vmax.f32 %v1166_v38, 0.0  ;;  %v1923_v43 = vpop.f32.mrb[19].mxu1 }
 0x78f   : > { %v1180_v45 = vmul.f32 %v1178_v44, %v1171_v42 }
 0x791   : > { %v2858_v46 = vadd.f32 %v1180_v45, %v2809_v14 }
 0x793   : > { %v1182_v47 = vpack.c.bf16 %v2858_v46, %v2858_v46 }
 0x795   : > { %1941 = vmatmul.mubr.bf16.vlgmr.msra.gmra.mrb[12].mxu0 %v1182_v47 }
 0x796   : > { %1971 = vmatpush3.bf16.msra.mxu0 %v2653_v18  ;;  %1986 = vmatprep.mubr.msk.bf16.mxu0 %vm2326_vm0, %v2325_v0 }
 0x797   : > { %1972 = vmatprep.subr.bf16.mxu0 %v2325_v0 }
 0x79a   : > { %1973 = vmatpush3.bf16.msra.mxu0 %v2657_v19 }
 0x79b   : > { %1974 = vmatprep.subr.bf16.mxu0 %v2325_v0 }
 0x79e   : > { %1975 = vmatpush3.bf16.msra.mxu0 %v2662_v20 }
 0x79f   : > { %1976 = vmatprep.subr.bf16.mxu0 %v2325_v0 }
 0x7a2   : > { %1977 = vmatpush3.bf16.msra.mxu0 %v2667_v21 }
 0x7a3   : > { %1978 = vmatprep.subr.bf16.mxu0 %v2325_v0 }
 0x7a6   : > { %1979 = vmatpush3.bf16.msra.mxu0 %v2672_v22 }
 0x7a7   : > { %1980 = vmatprep.subr.bf16.mxu0 %v2325_v0 }
 0x7aa   : > { %1981 = vmatpush3.bf16.msra.mxu0 %v2677_v23 }
 0x7ab   : > { %1982 = vmatprep.subr.bf16.mxu0 %v2325_v0 }
 0x7ae   : > { %1983 = vmatpush3.bf16.msra.mxu0 %v2682_v24  ;;  %v1685_v24 = vsel %vm1310_vm5, 1.0, %v2325_v0 }
 0x7af   : > { %1984 = vmatprep.subr.bf16.mxu0 %v2325_v0  ;;  %1315 = vperm.xlu1 %2094, %v1685_v24  }
 0x7b2   : > { %1985 = vmatpush3.bf16.msra.mxu0 %v2693_v33  ;;  %v1687_v33 = vsel %vm1448_vm6, 1.0, %v2325_v0 }
 0x7b3   : > { %1996 = vmatprep.subr.bf16.mxu0 %v2325_v0  ;;  %1453 = vperm.xlu1 %2094, %v1687_v33  }
 0x82e   : > { %v1316_v8 = vpop.permute.xlu1 %1315 }
 0x832   : > { %v1454_v28 = vpop.permute.xlu1 %1453 }
 0x868   : > { %v1217_v18 = vpop.f32.mrb[12].mxu0 }
 0x869   : > { %v1218_v19 = vadd.f32 %v2734_v41, %v1217_v18  ;;  %v1942_v20 = vpop.f32.mrb[13].mxu0 }
 0x86a   : > { %v1220_v21 = vpop.f32.mrb[14].mxu0 }
 0x86b   : > { %v1223_v22 = vmax.f32 %v1218_v19, 0.0  ;;  %v1943_v48 = vpop.f32.mrb[15].mxu0 }
 0x86d   : > { %v1224_v49 = vpack.c.bf16 %v1223_v22, %v1223_v22 }
 0x86f   : > { %v1226_v23 = vsel %vm894_vm1, %v1224_v49, 0 }
 0x870   : > { %1945 = vmatpush3.bf16.msra.mxu1 %v1226_v23 }
 0x871   : > { %1950 = vmatprep.subr.bf16.mxu1 %v2325_v0 }
 0x873   : > { %1947 = vmatmul.mubr.msk.bf16.vlgmr.msra.gmra.mrb[20].mxu1 %vm890_vm2, %v2742_v50 }
 0x874   : > { %1951 = vmatpush3.bf16.msra.mxu1 %v2745_v51  ;;  %1966 = vmatprep.mubr.msk.bf16.mxu1 %vm2326_vm0, %v2325_v0 }
 0x875   : > { %1952 = vmatprep.subr.bf16.mxu1 %v2325_v0 }
 0x878   : > { %1953 = vmatpush3.bf16.msra.mxu1 %v2752_v52 }
 0x879   : > { %1954 = vmatprep.subr.bf16.mxu1 %v2325_v0 }
 0x87c   : > { %1955 = vmatpush3.bf16.msra.mxu1 %v2759_v53 }
 0x87d   : > { %1956 = vmatprep.subr.bf16.mxu1 %v2325_v0 }
 0x880   : > { %1957 = vmatpush3.bf16.msra.mxu1 %v2764_v54 }
 0x881   : > { %1958 = vmatprep.subr.bf16.mxu1 %v2325_v0 }
 0x884   : > { %1959 = vmatpush3.bf16.msra.mxu1 %v2769_v55 }
 0x885   : > { %1960 = vmatprep.subr.bf16.mxu1 %v2325_v0 }
 0x888   : > { %1961 = vmatpush3.bf16.msra.mxu1 %v2774_v56 }
 0x889   : > { %1962 = vmatprep.subr.bf16.mxu1 %v2325_v0 }
 0x88c   : > { %1963 = vmatpush3.bf16.msra.mxu1 %v2779_v57 }
 0x88d   : > { %1964 = vmatprep.subr.bf16.mxu1 %v2325_v0 }
 0x890   : > { %1965 = vmatpush3.bf16.msra.mxu1 %v2785_v58 }
 0x891   : > { %1990 = vmatprep.subr.bf16.mxu1 %v2325_v0 }
 0x946   : > { %v1262_v59 = vpop.f32.mrb[20].mxu1 }
 0x947   : > { %v1268_v61 = vpack.c.bf16 %v1262_v59, %v1262_v59  ;;  %v1948_v62 = vpop.f32.mrb[21].mxu1 }
 0x948   : > { %v1265_v63 = vpop.f32.mrb[22].mxu1 }
 0x949   : > { %v1949_v1 = vpop.f32.mrb[23].mxu1  ;;  %1967 = vmatmul.mubr.bf16.vlgmr.msra.gmra.mrb[24].mxu1 %v1268_v61 }
 0x94a   : > { %1992 = vmatprep.mubr.msk.bf16.mxu1 %vm2326_vm0, %v2325_v0 }
 0xa1c   : > { %v1303_v2 = vpop.f32.mrb[24].mxu1 }
 0xa1d   : > { %v1304_v3 = vadd.f32 %v2805_v5, %v1303_v2  ;;  %v1968_v4 = vpop.f32.mrb[25].mxu1 }
 0xa1e   : > { %v1306_v60 = vpop.f32.mrb[26].mxu1 }
 0xa1f   : > { %v1309_v6 = vmax.f32 %v1304_v3, 0.0  ;;  %v1969_v7 = vpop.f32.mrb[27].mxu1 }
 0xa21   : > { %v1318_v9 = vmul.f32 %v1316_v8, %v1309_v6 }
 0xa23   : > { %v1319_v10 = vadd.f32 %v1318_v9, %v2858_v46 }
 0xa25   : > { %v1320_v11 = vpack.c.bf16 %v1319_v10, %v1319_v10 }
 0xa27   : > { %1987 = vmatmul.mubr.bf16.vlgmr.msra.gmra.mrb[16].mxu0 %v1320_v11 }
 0xa28   : > { %1997 = vmatpush3.bf16.msra.mxu0 %v2745_v51  ;;  %2012 = vmatprep.mubr.msk.bf16.mxu0 %vm2326_vm0, %v2325_v0 }
 0xa29   : > { %1998 = vmatprep.subr.bf16.mxu0 %v2325_v0 }
 0xa2c   : > { %1999 = vmatpush3.bf16.msra.mxu0 %v2752_v52 }
 0xa2d   : > { %2000 = vmatprep.subr.bf16.mxu0 %v2325_v0 }
 0xa30   : > { %2001 = vmatpush3.bf16.msra.mxu0 %v2759_v53 }
 0xa31   : > { %2002 = vmatprep.subr.bf16.mxu0 %v2325_v0 }
 0xa34   : > { %2003 = vmatpush3.bf16.msra.mxu0 %v2764_v54 }
 0xa35   : > { %2004 = vmatprep.subr.bf16.mxu0 %v2325_v0 }
 0xa38   : > { %2005 = vmatpush3.bf16.msra.mxu0 %v2769_v55 }
 0xa39   : > { %2006 = vmatprep.subr.bf16.mxu0 %v2325_v0 }
 0xa3c   : > { %2007 = vmatpush3.bf16.msra.mxu0 %v2774_v56 }
 0xa3d   : > { %2008 = vmatprep.subr.bf16.mxu0 %v2325_v0 }
 0xa40   : > { %2009 = vmatpush3.bf16.msra.mxu0 %v2779_v57 }
 0xa41   : > { %2010 = vmatprep.subr.bf16.mxu0 %v2325_v0 }
 0xa44   : > { %2011 = vmatpush3.bf16.msra.mxu0 %v2785_v58 }
 0xafa   : > { %v1355_v51 = vpop.f32.mrb[16].mxu0 }
 0xafb   : > { %v1356_v52 = vadd.f32 %v2734_v41, %v1355_v51  ;;  %v1988_v53 = vpop.f32.mrb[17].mxu0 }
 0xafc   : > { %v1358_v54 = vpop.f32.mrb[18].mxu0 }
 0xafd   : > { %v1361_v12 = vmax.f32 %v1356_v52, 0.0  ;;  %v1989_v55 = vpop.f32.mrb[19].mxu0 }
 0xaff   : > { %v1362_v13 = vpack.c.bf16 %v1361_v12, %v1361_v12 }
 0xb01   : > { %v1364_v14 = vsel %vm894_vm1, %v1362_v13, 0 }
 0xb02   : > { %1991 = vmatpush3.bf16.msra.mxu1 %v1364_v14 }
 0xb05   : > { %1993 = vmatmul.mubr.msk.bf16.vlgmr.msra.gmra.mrb[28].mxu1 %vm890_vm2, %v2742_v50 }
 0xbd8   : > { %v1400_v56 = vpop.f32.mrb[28].mxu1 }
 0xbd9   : > { %v1406_v0 = vpack.c.bf16 %v1400_v56, %v1400_v56  ;;  %v1994_v57 = vpop.f32.mrb[29].mxu1 }
 0xbda   : > { %v1403_v58 = vpop.f32.mrb[30].mxu1 }
 0xbdb   : > { %2013 = vmatmul.mubr.bf16.vlgmr.msra.gmra.mrb[20].mxu0 %v1406_v0  ;;  %v1995_v15 = vpop.f32.mrb[31].mxu1 }
 0xcae   : > { %v1441_v41 = vpop.f32.mrb[20].mxu0 }
 0xcaf   : > { %v1442_v16 = vadd.f32 %v2805_v5, %v1441_v41  ;;  %v2014_v17 = vpop.f32.mrb[21].mxu0 }
 0xcb0   : > { %v1444_v25 = vpop.f32.mrb[22].mxu0 }
 0xcb1   : > { %v1447_v26 = vmax.f32 %v1442_v16, 0.0  ;;  %v2015_v27 = vpop.f32.mrb[23].mxu0 }
 0xcb3   : > { %v1456_v29 = vmul.f32 %v1454_v28, %v1447_v26 }
 0xcb5   : > { %v1457_v50 = vadd.f32 %v1456_v29, %v1319_v10 }
 0xcb7   : > { %v1458_v30 = vpack.c.bf16 %v1457_v50, %v1457_v50 }
 0xcb9   : > { %1459 = vst [vmem:[%s516_s15] sm:$0xf] %v1458_v30 }
 0xcba   : > { %2256 = shalt.err (!%p2253_p1)
}
 0xcbb   : > { %s2257_s26 = scalar_lea.hbm %s2938_s25, 64  ;;  %s2261_s13 = scalar_lea.hbm %s3051_s8, 128 }
 0xcbc   : > { %p2258_p2 = scmp.ne.s32.totalorder %s2938_s25, %s2257_s26  ;;  %p2262_p3 = scmp.lt.u32.totalorder %s2938_s25, %s3051_s8 }
 0xcbd   : > { %p2263_p12 = scmp.lt.u32.totalorder %s2261_s13, %s2257_s26  ;;  %p2265_p9 = scmp.lt.u32.totalorder %s2257_s26, %s2938_s25 }
 0xcbe   : > { %p2259_p5 = pnand %p2258_p2, %p3052_p0 }
 0xcbf   : > { %p2264_p7 = por %p2263_p12, %p2262_p3 }
 0xcc0   : > { %p2260_p13 = pneg %p2259_p5 }
 0xcc1   : > { %p2266_p11 = por %p2265_p9, %p2264_p7 }
 0xcc3   : > { %p2267_p8 = pnand %p2266_p11, %p2260_p13 }
 0xcc5   : > { %2270 = shalt.err (!%p2267_p8)
}
 0xcc6   : > { %2028 = dma.vmem_to_hbm [thread:$0]  (%p3052_p0), %s2940_s27, 64, %s2938_s25, %s1461_s29  }
 0xcc7 PF: > { %s3053_s1 = sld [smem:[#allocation14_spill]]  ;;  %s3054_s5 = sld [smem:[#allocation19_spill]] }
 0xcc8   : > { %p3056_p4 = scmp.ge.s32.totalorder %s2317_s20, 2 }
 0xccd   : > { %s1486_s10 = sand.u32 1, %s3053_s1   ;;  %p3055_p10 = scmp.ne.s32.totalorder %s3054_s5, 0 }
 0xcce   : > { %s1487_s24 = scalar_lea.sflag [#allocation4], %s1486_s10 }
 0xccf   : > { %p2045_p6 = pnand %p3056_p4, %p3055_p10 }
 0xcd1   : > { %2300 = dma.done.wait (!%p2045_p6), %s1487_s24, 64  }
 0xcd2   : > { %2302 = vsyncadd (!%p2045_p6), %s1487_s24, 4294967232  ;;  %s3057_s20 = sld [smem:[#allocation16_spill]]  ;;  %s3058_s15 = sld [smem:[#allocation15_spill]] }
 0xcd3   : > { %s3059_s19 = sld [smem:[#allocation17_spill]]  ;;  %s3060_s17 = smov %s2309_s18 }
 0xcd8   : > { %p23_p1 = scmp.ge.s32.totalorder %s3057_s20, 4   ;;  %s3061_s18 = smov %s3058_s15 }
 0xcda   :  { %25 = sbr.rel (!%p23_p1) target bundleno = 11 (0xb), region = 139 }
 0xce1   :  { %1492 = vsyncpa [#allocation3], 1 }
 0xce2   :  { %1494 = vsyncpa [#allocation3 + $0x1], 1 }
 0xce3   :  { %1495 = vsyncpa [#allocation6], 1 }
 0xce4   :  { %1496 = vsyncpa [#allocation4], 1 }
 0xce5   :  { %1498 = vsyncpa [#allocation4 + $0x1], 1 }

</bundles_post_ra>
